<compile_context>
chip_gen: v5e
topology: v5e:2x2
jax: 0.10.0
libtpu: 0.0.40
codegen_flags: <defaults>
</compile_context>

<pallas_src>
import numpy as np
import jax
import jax.numpy as jnp
from jax.experimental import pallas as pl
from jax.experimental.pallas import tpu as pltpu

UNDO = [4, 12, 20, 28, 5, 13, 21, 29, 6, 14, 22, 30, 7, 15, 23, 31,
        24, 25, 26, 27, 16, 17, 18, 19, 8, 9, 10, 11, 0, 1, 2, 3,
        59, 51, 43, 35, 58, 50, 42, 34, 57, 49, 41, 33, 56, 48, 40, 32]

# Padded (lane/MXU-friendly) feature widths used inside the kernel.
D_IN = 17     # input width (kept as the full last dim of x; padding would only add DMA)
D_H1 = 256    # 250 -> 256
D_H2 = 256    # 150 -> 256
D_H3 = 128    # already aligned
D_OUT = 48    # output width (full last dim of the output block)

TM_MAX = 1024  # batch-tile cap (amortizes per-step overhead; working set << VMEM)


# ---------------------------------------------------------------------------
# Kernel body: one batch tile, all four matmuls fused (bf16 operands, f32 acc).
# ---------------------------------------------------------------------------
def decoder_kernel(x_ref, w1_ref, b1_ref, w2_ref, b2_ref, w3_ref, b3_ref,
                   wc_ref, bc_ref, o_ref):
    bf16 = jnp.bfloat16
    # Linear(17,250) + ReLU   (padded to 256 cols; padded cols stay 0)
    h = jnp.dot(x_ref[...].astype(bf16), w1_ref[...],
                preferred_element_type=jnp.float32)
    h = jnp.maximum(h + b1_ref[...], 0.0)
    # Linear(250,150) + ReLU  (padded to 256x256)
    h = jnp.dot(h.astype(bf16), w2_ref[...], preferred_element_type=jnp.float32)
    h = jnp.maximum(h + b2_ref[...], 0.0)
    # Linear(150,128) + ReLU  (padded to 256x128)
    h = jnp.dot(h.astype(bf16), w3_ref[...], preferred_element_type=jnp.float32)
    h = jnp.maximum(h + b3_ref[...], 0.0)
    # ConvTranspose2d(8,1,2,stride=2) + flatten + undo-gather folded to (128,48), then ReLU
    y = jnp.dot(h.astype(bf16), wc_ref[...], preferred_element_type=jnp.float32)
    o_ref[...] = jnp.maximum(y + bc_ref[...], 0.0)


# ---------------------------------------------------------------------------
# Parameter construction (PyTorch-shaped) and one-time folding / padding / casting.
# ---------------------------------------------------------------------------
def build_params(key):
    """Deterministic synthetic parameters matching the PyTorch module shapes."""
    ks = jax.random.split(key, 8)
    # nn.Linear stores (out, in); we keep (in, out) so the kernel does x @ W.
    w1 = jax.random.normal(ks[0], (17, 250), jnp.float32) * 0.1
    b1 = jax.random.normal(ks[1], (1, 250), jnp.float32) * 0.1
    w2 = jax.random.normal(ks[2], (250, 150), jnp.float32) * 0.1
    b2 = jax.random.normal(ks[3], (1, 150), jnp.float32) * 0.1
    w3 = jax.random.normal(ks[4], (150, 128), jnp.float32) * 0.1
    b3 = jax.random.normal(ks[5], (1, 128), jnp.float32) * 0.1
    # ConvTranspose2d(8, 1, 2, stride=2): weight (in_ch=8, out_ch=1, 2, 2), bias (1,)
    w_conv = jax.random.normal(ks[6], (8, 1, 2, 2), jnp.float32) * 0.1
    b_conv = jax.random.normal(ks[7], (1,), jnp.float32) * 0.1
    return w1, b1, w2, b2, w3, b3, w_conv, b_conv


def fold_conv_and_undo(w_conv, b_conv):
    """Fold stride-2 ConvTranspose2d + flatten + undo-gather into a (128,48) matmul.

    Hidden flat index = c*16 + i*4 + j (NCHW view of (B,8,4,4)).
    Conv output flat index = (2i+di)*8 + (2j+dj) for (B,1,8,8) flattened.
    out[b, k] = sum_c h[b, c*16+i*4+j] * w_conv[c,0,di,dj] + b_conv  where
    undo[k] = (2i+di)*8 + (2j+dj).  ReLU commutes with the column permutation.
    """
    w_conv = np.asarray(w_conv)
    wc = np.zeros((D_H3, D_OUT), dtype=np.float32)
    for k, out_idx in enumerate(UNDO):
        oi, oj = divmod(out_idx, 8)
        i, di = divmod(oi, 2)
        j, dj = divmod(oj, 2)
        for c in range(8):
            wc[c * 16 + i * 4 + j, k] = w_conv[c, 0, di, dj]
    bc = np.full((1, D_OUT), float(np.asarray(b_conv)[0]), dtype=np.float32)
    return wc, bc


def prepare_folded_params(params):
    """One-time host-side fold + zero-pad + bf16 cast (call OUTSIDE jit)."""
    w1, b1, w2, b2, w3, b3, w_conv, b_conv = (np.asarray(p) for p in params)

    def pad2(a, shape):
        out = np.zeros(shape, np.float32)
        out[:a.shape[0], :a.shape[1]] = a
        return out

    w1p = pad2(w1, (D_IN, D_H1))
    b1p = pad2(b1.reshape(1, -1), (1, D_H1))
    w2p = pad2(w2, (D_H1, D_H2))
    b2p = pad2(b2.reshape(1, -1), (1, D_H2))
    w3p = pad2(w3, (D_H2, D_H3))
    b3p = pad2(b3.reshape(1, -1), (1, D_H3))
    wc, bc = fold_conv_and_undo(w_conv, b_conv)
    # Weights in bf16 (MXU-native, half the DMA); biases stay f32 for the f32 epilogue.
    return (jnp.asarray(w1p, jnp.bfloat16), jnp.asarray(b1p),
            jnp.asarray(w2p, jnp.bfloat16), jnp.asarray(b2p),
            jnp.asarray(w3p, jnp.bfloat16), jnp.asarray(b3p),
            jnp.asarray(wc, jnp.bfloat16), jnp.asarray(bc))


# ---------------------------------------------------------------------------
# Batch tiling: balanced, even tile count (v7x 2-TC sharding), minimal padding.
# ---------------------------------------------------------------------------
def _batch_tile(batch):
    if batch <= 8:
        return 8                                    # single sublane-aligned tile
    n_tiles = max(2, -(-batch // TM_MAX))           # >=2 tiles so both v7x TCs work
    n_tiles += n_tiles % 2                          # even count for balanced sharding
    tm = -(-batch // n_tiles)
    return ((tm + 7) // 8) * 8                      # sublane-align; minimal row padding


# ---------------------------------------------------------------------------
# Forward (jitted).  Batch-tiled grid, weights VMEM-resident across steps.
# ---------------------------------------------------------------------------
@jax.jit
def cae_decoder_forward(x, folded_params):
    w1, b1, w2, b2, w3, b3, wc, bc = folded_params
    batch = x.shape[0]
    tm = _batch_tile(batch)
    grid = (pl.cdiv(batch, tm),)

    def resident(shape):
        # Same block every grid step -> stays VMEM-resident (no re-DMA).
        return pl.BlockSpec(shape, lambda i: (0, 0))

    flops = 2 * batch * (D_IN * D_H1 + D_H1 * D_H2 + D_H2 * D_H3 + D_H3 * D_OUT)
    bytes_accessed = (4 * (x.size + batch * D_OUT + b1.size + b2.size + b3.size + bc.size)
                      + 2 * (w1.size + w2.size + w3.size + wc.size))

    return pl.pallas_call(
        decoder_kernel,
        out_shape=jax.ShapeDtypeStruct((batch, D_OUT), jnp.float32),
        grid=grid,
        in_specs=[
            pl.BlockSpec((tm, D_IN), lambda i: (i, 0)),     # x tile moves with grid
            resident((D_IN, D_H1)), resident((1, D_H1)),    # w1 (bf16), b1 (f32)
            resident((D_H1, D_H2)), resident((1, D_H2)),    # w2, b2
            resident((D_H2, D_H3)), resident((1, D_H3)),    # w3, b3
            resident((D_H3, D_OUT)), resident((1, D_OUT)),  # folded conv+undo
        ],
        out_specs=pl.BlockSpec((tm, D_OUT), lambda i: (i, 0)),
        compiler_params=pltpu.CompilerParams(
            dimension_semantics=("parallel",),               # v7x: shard tiles across 2 TCs
            vmem_limit_bytes=32 * 1024 * 1024),              # headroom on v5e's 16 MiB default
        cost_estimate=pl.CostEstimate(flops=flops, transcendentals=0,
                                      bytes_accessed=bytes_accessed),
    )(x, w1, b1, w2, b2, w3, b3, wc, bc)


# ---------------------------------------------------------------------------
# Pure-JAX f32 reference mirroring the PyTorch graph step by step.
# ---------------------------------------------------------------------------
def reference_forward(x, params):
    w1, b1, w2, b2, w3, b3, w_conv, b_conv = params
    h = jax.nn.relu(x @ w1 + b1)
    h = jax.nn.relu(h @ w2 + b2)
    h = jax.nn.relu(h @ w3 + b3)
    B = x.shape[0]
    h = h.reshape(B, 8, 4, 4)
    out = jnp.zeros((B, 1, 8, 8), jnp.float32)
    for di in range(2):
        for dj in range(2):
            blk = jnp.einsum('bcij,c->bij', h, w_conv[:, 0, di, dj]) + b_conv[0]
            out = out.at[:, 0, di::2, dj::2].set(blk)
    out = jax.nn.relu(out)
    flat = out.reshape(B, 64)
    return flat[:, jnp.asarray(UNDO)]


if __name__ == "__main__":
    key = jax.random.PRNGKey(0)
    k_x, k_p, k_x2 = jax.random.split(key, 3)
    params = build_params(k_p)
    folded = prepare_folded_params(params)   # one-time fold/pad/bf16-cast, outside jit

    # Small debug batch (single-tile path).
    B = 8
    x = jax.random.normal(k_x, (B, 17), jnp.float32)
    out = jax.block_until_ready(cae_decoder_forward(x, folded))
    ref = jax.block_until_ready(reference_forward(x, params))
    assert out.shape == (B, 48), out.shape
    # bf16 matmul operands -> ~1e-2-level deviation from the f32 reference is expected.
    np.testing.assert_allclose(np.asarray(out), np.asarray(ref), rtol=2e-2, atol=2e-2)

    # Exercise the balanced multi-tile grid (600 -> 2 tiles of 304/296 rows).
    B2 = 600
    x2 = jax.random.normal(k_x2, (B2, 17), jnp.float32)
    out2 = jax.block_until_ready(cae_decoder_forward(x2, folded))
    ref2 = jax.block_until_ready(reference_forward(x2, params))
    np.testing.assert_allclose(np.asarray(out2), np.asarray(ref2), rtol=2e-2, atol=2e-2)

    print("KERNEL_OK")
</pallas_src>

<mosaic_0001>
module attributes {stable_mosaic.version = 11 : i64} {
  func.func @decoder_kernel(%arg0: i32, %arg1: memref<8x17xf32, #tpu.memory_space<vmem>>, %arg2: memref<17x256xbf16, #tpu.memory_space<vmem>>, %arg3: memref<1x256xf32, #tpu.memory_space<vmem>>, %arg4: memref<256x256xbf16, #tpu.memory_space<vmem>>, %arg5: memref<1x256xf32, #tpu.memory_space<vmem>>, %arg6: memref<256x128xbf16, #tpu.memory_space<vmem>>, %arg7: memref<1x128xf32, #tpu.memory_space<vmem>>, %arg8: memref<128x48xbf16, #tpu.memory_space<vmem>>, %arg9: memref<1x48xf32, #tpu.memory_space<vmem>>, %arg10: memref<8x48xf32, #tpu.memory_space<vmem>>) attributes {dimension_semantics = [#tpu.dimension_semantics<parallel>], iteration_bounds = array<i64: 1>, scalar_prefetch = 0 : i64, scratch_operands = 0 : i64, tpu.core_type = #tpu.core_type<tc>, window_params = [{transform_indices = @transform_0, window_bounds = array<i64: 8, 17>}, {pipeline_mode = #tpu.pipeline_mode<synchronous>, transform_indices = @transform_1, window_bounds = array<i64: 17, 256>}, {pipeline_mode = #tpu.pipeline_mode<synchronous>, transform_indices = @transform_2, window_bounds = array<i64: 1, 256>}, {pipeline_mode = #tpu.pipeline_mode<synchronous>, transform_indices = @transform_3, window_bounds = array<i64: 256, 256>}, {pipeline_mode = #tpu.pipeline_mode<synchronous>, transform_indices = @transform_4, window_bounds = array<i64: 1, 256>}, {pipeline_mode = #tpu.pipeline_mode<synchronous>, transform_indices = @transform_5, window_bounds = array<i64: 256, 128>}, {pipeline_mode = #tpu.pipeline_mode<synchronous>, transform_indices = @transform_6, window_bounds = array<i64: 1, 128>}, {pipeline_mode = #tpu.pipeline_mode<synchronous>, transform_indices = @transform_7, window_bounds = array<i64: 128, 48>}, {pipeline_mode = #tpu.pipeline_mode<synchronous>, transform_indices = @transform_8, window_bounds = array<i64: 1, 48>}, {transform_indices = @transform_9, window_bounds = array<i64: 8, 48>}]} {
    %c0 = arith.constant 0 : index
    %c0_0 = arith.constant 0 : index
    %0 = vector.load %arg1[%c0, %c0_0] : memref<8x17xf32, #tpu.memory_space<vmem>>, vector<8x17xf32>
    %1 = arith.truncf %0 : vector<8x17xf32> to vector<8x17xbf16>
    %c0_1 = arith.constant 0 : index
    %c0_2 = arith.constant 0 : index
    %2 = vector.load %arg2[%c0_1, %c0_2] : memref<17x256xbf16, #tpu.memory_space<vmem>>, vector<17x256xbf16>
    %cst = arith.constant dense<0.000000e+00> : vector<8x256xf32>
    %3 = tpu.matmul %1, %2, %cst {dimension_numbers = #tpu.dot_dimension_numbers<[1], [0], [0], [1], [0, 0, 1, 1], [], []>} : vector<8x17xbf16>, vector<17x256xbf16>, vector<8x256xf32> -> vector<8x256xf32>
    %c0_3 = arith.constant 0 : index
    %c0_4 = arith.constant 0 : index
    %4 = vector.load %arg3[%c0_3, %c0_4] : memref<1x256xf32, #tpu.memory_space<vmem>>, vector<1x256xf32>
    %5 = vector.broadcast %4 : vector<1x256xf32> to vector<8x256xf32>
    %6 = arith.addf %3, %5 : vector<8x256xf32>
    %cst_5 = arith.constant 0.000000e+00 : f32
    %7 = vector.broadcast %cst_5 : f32 to vector<8x256xf32>
    %8 = arith.maximumf %6, %7 : vector<8x256xf32>
    %9 = arith.truncf %8 : vector<8x256xf32> to vector<8x256xbf16>
    %c0_6 = arith.constant 0 : index
    %c0_7 = arith.constant 0 : index
    %10 = vector.load %arg4[%c0_6, %c0_7] : memref<256x256xbf16, #tpu.memory_space<vmem>>, vector<256x256xbf16>
    %cst_8 = arith.constant dense<0.000000e+00> : vector<8x256xf32>
    %11 = tpu.matmul %9, %10, %cst_8 {dimension_numbers = #tpu.dot_dimension_numbers<[1], [0], [0], [1], [0, 0, 1, 1], [], []>} : vector<8x256xbf16>, vector<256x256xbf16>, vector<8x256xf32> -> vector<8x256xf32>
    %c0_9 = arith.constant 0 : index
    %c0_10 = arith.constant 0 : index
    %12 = vector.load %arg5[%c0_9, %c0_10] : memref<1x256xf32, #tpu.memory_space<vmem>>, vector<1x256xf32>
    %13 = vector.broadcast %12 : vector<1x256xf32> to vector<8x256xf32>
    %14 = arith.addf %11, %13 : vector<8x256xf32>
    %cst_11 = arith.constant 0.000000e+00 : f32
    %15 = vector.broadcast %cst_11 : f32 to vector<8x256xf32>
    %16 = arith.maximumf %14, %15 : vector<8x256xf32>
    %17 = arith.truncf %16 : vector<8x256xf32> to vector<8x256xbf16>
    %c0_12 = arith.constant 0 : index
    %c0_13 = arith.constant 0 : index
    %18 = vector.load %arg6[%c0_12, %c0_13] : memref<256x128xbf16, #tpu.memory_space<vmem>>, vector<256x128xbf16>
    %cst_14 = arith.constant dense<0.000000e+00> : vector<8x128xf32>
    %19 = tpu.matmul %17, %18, %cst_14 {dimension_numbers = #tpu.dot_dimension_numbers<[1], [0], [0], [1], [0, 0, 1, 1], [], []>} : vector<8x256xbf16>, vector<256x128xbf16>, vector<8x128xf32> -> vector<8x128xf32>
    %c0_15 = arith.constant 0 : index
    %c0_16 = arith.constant 0 : index
    %20 = vector.load %arg7[%c0_15, %c0_16] : memref<1x128xf32, #tpu.memory_space<vmem>>, vector<1x128xf32>
    %21 = vector.broadcast %20 : vector<1x128xf32> to vector<8x128xf32>
    %22 = arith.addf %19, %21 : vector<8x128xf32>
    %cst_17 = arith.constant 0.000000e+00 : f32
    %23 = vector.broadcast %cst_17 : f32 to vector<8x128xf32>
    %24 = arith.maximumf %22, %23 : vector<8x128xf32>
    %25 = arith.truncf %24 : vector<8x128xf32> to vector<8x128xbf16>
    %c0_18 = arith.constant 0 : index
    %c0_19 = arith.constant 0 : index
    %26 = vector.load %arg8[%c0_18, %c0_19] : memref<128x48xbf16, #tpu.memory_space<vmem>>, vector<128x48xbf16>
    %cst_20 = arith.constant dense<0.000000e+00> : vector<8x48xf32>
    %27 = tpu.matmul %25, %26, %cst_20 {dimension_numbers = #tpu.dot_dimension_numbers<[1], [0], [0], [1], [0, 0, 1, 1], [], []>} : vector<8x128xbf16>, vector<128x48xbf16>, vector<8x48xf32> -> vector<8x48xf32>
    %c0_21 = arith.constant 0 : index
    %c0_22 = arith.constant 0 : index
    %28 = vector.load %arg9[%c0_21, %c0_22] : memref<1x48xf32, #tpu.memory_space<vmem>>, vector<1x48xf32>
    %29 = vector.broadcast %28 : vector<1x48xf32> to vector<8x48xf32>
    %30 = arith.addf %27, %29 : vector<8x48xf32>
    %cst_23 = arith.constant 0.000000e+00 : f32
    %31 = vector.broadcast %cst_23 : f32 to vector<8x48xf32>
    %32 = arith.maximumf %30, %31 : vector<8x48xf32>
    %c0_24 = arith.constant 0 : index
    %c0_25 = arith.constant 0 : index
    %33 = vector.load %arg10[%c0_24, %c0_25] : memref<8x48xf32, #tpu.memory_space<vmem>>, vector<8x48xf32>
    tpu.vector_store %arg10[%c0_24, %c0_25], %32 {strides = array<i32>} : memref<8x48xf32, #tpu.memory_space<vmem>>, vector<8x48xf32>,
    return
  }
  func.func @transform_0(%arg0: i32) -> (i32, i32) {
    %c0_i32 = arith.constant 0 : i32
    %c0_i32_0 = arith.constant 0 : i32
    return %arg0, %c0_i32 : i32, i32
  }
  func.func @transform_1(%arg0: i32) -> (i32, i32) {
    %c0_i32 = arith.constant 0 : i32
    %c0_i32_0 = arith.constant 0 : i32
    %c0_i32_1 = arith.constant 0 : i32
    return %c0_i32, %c0_i32_0 : i32, i32
  }
  func.func @transform_2(%arg0: i32) -> (i32, i32) {
    %c0_i32 = arith.constant 0 : i32
    %c0_i32_0 = arith.constant 0 : i32
    %c0_i32_1 = arith.constant 0 : i32
    return %c0_i32, %c0_i32_0 : i32, i32
  }
  func.func @transform_3(%arg0: i32) -> (i32, i32) {
    %c0_i32 = arith.constant 0 : i32
    %c0_i32_0 = arith.constant 0 : i32
    %c0_i32_1 = arith.constant 0 : i32
    return %c0_i32, %c0_i32_0 : i32, i32
  }
  func.func @transform_4(%arg0: i32) -> (i32, i32) {
    %c0_i32 = arith.constant 0 : i32
    %c0_i32_0 = arith.constant 0 : i32
    %c0_i32_1 = arith.constant 0 : i32
    return %c0_i32, %c0_i32_0 : i32, i32
  }
  func.func @transform_5(%arg0: i32) -> (i32, i32) {
    %c0_i32 = arith.constant 0 : i32
    %c0_i32_0 = arith.constant 0 : i32
    %c0_i32_1 = arith.constant 0 : i32
    return %c0_i32, %c0_i32_0 : i32, i32
  }
  func.func @transform_6(%arg0: i32) -> (i32, i32) {
    %c0_i32 = arith.constant 0 : i32
    %c0_i32_0 = arith.constant 0 : i32
    %c0_i32_1 = arith.constant 0 : i32
    return %c0_i32, %c0_i32_0 : i32, i32
  }
  func.func @transform_7(%arg0: i32) -> (i32, i32) {
    %c0_i32 = arith.constant 0 : i32
    %c0_i32_0 = arith.constant 0 : i32
    %c0_i32_1 = arith.constant 0 : i32
    return %c0_i32, %c0_i32_0 : i32, i32
  }
  func.func @transform_8(%arg0: i32) -> (i32, i32) {
    %c0_i32 = arith.constant 0 : i32
    %c0_i32_0 = arith.constant 0 : i32
    %c0_i32_1 = arith.constant 0 : i32
    return %c0_i32, %c0_i32_0 : i32, i32
  }
  func.func @transform_9(%arg0: i32) -> (i32, i32) {
    %c0_i32 = arith.constant 0 : i32
    %c0_i32_0 = arith.constant 0 : i32
    return %arg0, %c0_i32 : i32, i32
  }
}

</mosaic_0001>

<bundles_post_ra>
// kernel: cae_decoder_forward.1
= control target key start
LH: loop header
LB: loop body
LE: loop exit
PB: predicated region body
PF: predicated region fallthrough
CT: control target
= control target key end

     0   :  { %14 = vsyncpa [#allocation3], 0  ;;  %s1154_s0 = inlined_call_operand.vmem [shape: f32[8,17], index: 0, kind: input, shape index: {}]   ;;  %s1155_s1 = inlined_call_operand.vmem [shape: bf16[17,256], index: 1, kind: input, shape index: {}]   ;;  %s1156_s2 = inlined_call_operand.vmem [shape: f32[1,256], index: 2, kind: input, shape index: {}]   ;;  %s1157_s3 = inlined_call_operand.hbm [shape: bf16[256,256], index: 3, kind: input, shape index: {}]   ;;  %s1158_s4 = inlined_call_operand.vmem [shape: f32[1,256], index: 4, kind: input, shape index: {}]   ;;  %s1159_s5 = inlined_call_operand.hbm [shape: bf16[256,128], index: 5, kind: input, shape index: {}]   ;;  %s1160_s6 = inlined_call_operand.vmem [shape: f32[1,128], index: 6, kind: input, shape index: {}]   ;;  %s1161_s7 = inlined_call_operand.vmem [shape: bf16[128,48], index: 7, kind: input, shape index: {}]   ;;  %s1162_s8 = inlined_call_operand.vmem [shape: f32[1,48], index: 8, kind: input, shape index: {}]   ;;  %s1163_s9 = inlined_call_operand.hbm [shape: f32[8,48], index: 9, kind: output, shape index: {}]  }
   0x1   :  { %15 = vsyncpa [#allocation6], 0 }
   0x2   :  { %16 = vsyncpa [#allocation4], 0  ;;  %s27_s11 = sshll.u32 %s1157_s3, 4  ;;  %s1031_s12 = smov [#allocation2]   ;;  %s28_s11 = int_to_ptr.hbm [resolvable:$true] %s27_s11 }
   0x3   :  { %s29_s13 = sshll.u32 %s1031_s12, 4  ;;  %s42_s16 = sshll.u32 %s1159_s5, 4  ;;  %s30_s13 = int_to_ptr.vmem [resolvable:$true] %s29_s13  ;;  %s43_s16 = int_to_ptr.hbm [resolvable:$true] %s42_s16 }
   0x4   :  { %s1032_s17 = smov 128   ;;  %s1033_s18 = smov 8  }
   0x5   :  { %35 = dma.hbm_to_vmem [thread:$0]  %s28_s11, 4096, %s30_s13, [#allocation3], %s1032_s17, %s1032_s17, %s1033_s18  }
   0x6   :  { %s1034_s19 = smov [#allocation5]   ;;  %s1035_s21 = smov 64  }
   0x7   :  { %s44_s20 = sshll.u32 %s1034_s19, 4  ;;  %s1036_s22 = smov 4   ;;  %s45_s20 = int_to_ptr.vmem [resolvable:$true] %s44_s20 }
   0x8   :  { %50 = dma.hbm_to_vmem [thread:$0]  %s43_s16, 2048, %s45_s20, [#allocation6], %s1035_s21, %s1035_s21, %s1036_s22  }
   0x9   :  { %1025 = dma.done.wait [#allocation3], 4096  }
   0xa   :  { %1026 = vsyncadd [#allocation3], 4294963200 }
   0xb   :  { %1027 = dma.done.wait [#allocation6], 2048  }
   0xc   :  { %1028 = vsyncadd [#allocation6], 4294965248  ;;  %vm96_vm0 = vcmask 1040384   ;;  %v70_v0 = vld [vmem:[%s1155_s1 + $0x10] sm:$0x11]  ;;  %v1037_v2 = vmov 0  }
   0xd   :  { %v84_v1 = vunpack.c.l.b16 %v70_v0  ;;  %v98_v3 = vsel %vm96_vm0, 65535, %v1037_v2  ;;  %v85_v4 = vunpack.c.h.b16 %v70_v0  ;;  %v653_v5 = vld [vmem:[%s1155_s1] sm:$0xf]  ;;  %v719_v6 = vld [vmem:[#allocation2 + $0x70] sm:$0xf]  ;;  %vm92_vm1 = vcmask 138240  }
   0xe   :  { %v902_v7 = vld [vmem:[#allocation2 + $0x74] sm:$0xf0]  ;;  %v901_v8 = vld [vmem:[#allocation2 + $0x74] sm:$0xf]  ;;  %v721_v11 = vld [vmem:[#allocation2 + $0x78] sm:$0xf0] }
   0xf   :  { %v88_v9 = vpack.c.b16 %v84_v1, %v84_v1  ;;  %v720_v10 = vor.u32 %v902_v7, %v719_v6  ;;  %v711_v12 = vld [vmem:[#allocation2 + $0x60] sm:$0xf]  ;;  %v900_v13 = vld [vmem:[#allocation2 + $0x64] sm:$0xf0]  ;;  %v89_v15 = vpack.c.b16 %v85_v4, %v85_v4  ;;  %v724_v16 = vor.u32 %v901_v8, %v721_v11  ;;  %v899_v17 = vld [vmem:[#allocation2 + $0x64] sm:$0xf] }
  0x10   :  { %v886_v14 = vld [vmem:[%s1155_s1 + $0x4] sm:$0xf0]  ;;  %v713_v18 = vld [vmem:[#allocation2 + $0x68] sm:$0xf0]  ;;  %v712_v20 = vor.u32 %v900_v13, %v711_v12  ;;  %v703_v22 = vld [vmem:[#allocation2 + $0x50] sm:$0xf] }
  0x11   :  { %v100_v19 = vand.u32 %v98_v3, %v88_v9  ;;  %333 = vmatpush.bf16.msra.mxu2 %v720_v10  ;;  %359 = vmatpush.bf16.msra.mxu0 %v724_v16  ;;  %v716_v21 = vor.u32 %v899_v17, %v713_v18  ;;  %v898_v23 = vld [vmem:[#allocation2 + $0x54] sm:$0xf0]  ;;  %v654_v24 = vor.u32 %v886_v14, %v653_v5  ;;  %v66_v25 = vld [vmem:[%s1154_s0] sm:$0xff]  ;;  %v897_v26 = vld [vmem:[#allocation2 + $0x54] sm:$0xf]  ;;  %s640_s0 = sshll.u32 %s1163_s9, 4  ;;  %s641_s0 = int_to_ptr.hbm [resolvable:$true] %s640_s0 }
  0x12   :  { %v705_v27 = vld [vmem:[#allocation2 + $0x58] sm:$0xf0]  ;;  %v103_v28 = vand.u32 %v98_v3, %v89_v15  ;;  %v885_v29 = vld [vmem:[%s1155_s1 + $0x4] sm:$0xf]  ;;  %v783_v30 = vld [vmem:[#allocation2 + $0xf0] sm:$0xf]  ;;  %v704_v33 = vor.u32 %v898_v23, %v703_v22  ;;  %v67_v37 = vpack.c.bf16 %v66_v25, %v66_v25 }
  0x13   :  { %111 = vmatpush.bf16.msra.mxu1 %v100_v19  ;;  %v918_v31 = vld [vmem:[#allocation2 + $0xf4] sm:$0xf0]  ;;  %v655_v32 = vld [vmem:[%s1155_s1 + $0x8] sm:$0xf0]  ;;  %v695_v34 = vld [vmem:[#allocation2 + $0x40] sm:$0xf]  ;;  %v708_v38 = vor.u32 %v897_v26, %v705_v27 }
  0x14   :  { %v896_v35 = vld [vmem:[#allocation2 + $0x44] sm:$0xf0]  ;;  %v784_v36 = vor.u32 %v918_v31, %v783_v30  ;;  %v917_v39 = vld [vmem:[#allocation2 + $0xf4] sm:$0xf]  ;;  %v785_v40 = vld [vmem:[#allocation2 + $0xf8] sm:$0xf0]  ;;  %v658_v45 = vor.u32 %v885_v29, %v655_v32 }
  0x15   :  { %334 = vmatpush.bf16.msra.mxu2 %v712_v20  ;;  %360 = vmatpush.bf16.msra.mxu0 %v716_v21  ;;  %v775_v41 = vld [vmem:[#allocation2 + $0xe0] sm:$0xf]  ;;  %v895_v42 = vld [vmem:[#allocation2 + $0x44] sm:$0xf]  ;;  %v697_v43 = vld [vmem:[#allocation2 + $0x48] sm:$0xf0]  ;;  %v696_v47 = vor.u32 %v896_v35, %v695_v34  ;;  %v788_v49 = vor.u32 %v917_v39, %v785_v40 }
  0x16   :  { %346 = vmatpush.bf16.msra.mxu3 %v784_v36  ;;  %v916_v44 = vld [vmem:[#allocation2 + $0xe4] sm:$0xf0]  ;;  %v687_v48 = vld [vmem:[#allocation2 + $0x30] sm:$0xf]  ;;  %v700_v50 = vor.u32 %v895_v42, %v697_v43  ;;  %v894_v51 = vld [vmem:[#allocation2 + $0x34] sm:$0xf0] }
  0x17   :  { %112 = vmatpush.bf16.msra.mxu1 %v654_v24  ;;  %v776_v46 = vor.u32 %v916_v44, %v775_v41  ;;  %v915_v52 = vld [vmem:[#allocation2 + $0xe4] sm:$0xf]  ;;  %v777_v53 = vld [vmem:[#allocation2 + $0xe8] sm:$0xf0]  ;;  %v893_v54 = vld [vmem:[#allocation2 + $0x34] sm:$0xf]  ;;  %v688_v56 = vor.u32 %v894_v51, %v687_v48 }
  0x18   :  { %v689_v55 = vld [vmem:[#allocation2 + $0x38] sm:$0xf0]  ;;  %v780_v57 = vor.u32 %v915_v52, %v777_v53  ;;  %v679_v59 = vld [vmem:[#allocation2 + $0x20] sm:$0xf]  ;;  %v892_v60 = vld [vmem:[#allocation2 + $0x24] sm:$0xf0] }
  0x19   :  { %335 = vmatpush.bf16.msra.mxu2 %v704_v33  ;;  %361 = vmatpush.bf16.msra.mxu0 %v708_v38  ;;  %v692_v58 = vor.u32 %v893_v54, %v689_v55  ;;  %v891_v61 = vld [vmem:[#allocation2 + $0x24] sm:$0xf]  ;;  %v681_v62 = vld [vmem:[#allocation2 + $0x28] sm:$0xf0]  ;;  %v680_v63 = vor.u32 %v892_v60, %v679_v59  ;;  %v671_v1 = vld [vmem:[#allocation2 + $0x10] sm:$0xf] }
  0x1a   :  { %659 = vmatmul.msk.bf16.vlgmr.msra.gmra.mxu1 %vm92_vm1, %v67_v37  ;;  %347 = vmatpush.bf16.msra.mxu3 %v776_v46  ;;  %v684_v0 = vor.u32 %v891_v61, %v681_v62  ;;  %v890_v2 = vld [vmem:[#allocation2 + $0x14] sm:$0xf0]  ;;  %v767_v3 = vld [vmem:[#allocation2 + $0xd0] sm:$0xf]  ;;  %v889_v6 = vld [vmem:[#allocation2 + $0x14] sm:$0xf] }
  0x1b   :  { %124 = vmatpush.bf16.msrb.mxu1 %v103_v28  ;;  %v672_v4 = vor.u32 %v890_v2, %v671_v1  ;;  %v914_v5 = vld [vmem:[#allocation2 + $0xd4] sm:$0xf0]  ;;  %v673_v7 = vld [vmem:[#allocation2 + $0x18] sm:$0xf0]  ;;  %v913_v10 = vld [vmem:[#allocation2 + $0xd4] sm:$0xf] }
  0x1c   :  { %v768_v8 = vor.u32 %v914_v5, %v767_v3  ;;  %v676_v9 = vor.u32 %v889_v6, %v673_v7  ;;  %v769_v11 = vld [vmem:[#allocation2 + $0xd8] sm:$0xf0]  ;;  %v663_v13 = vld [vmem:[#allocation2] sm:$0xf]  ;;  %v888_v14 = vld [vmem:[#allocation2 + $0x4] sm:$0xf0] }
  0x1d   :  { %336 = vmatpush.bf16.msra.mxu2 %v696_v47  ;;  %362 = vmatpush.bf16.msra.mxu0 %v700_v50  ;;  %v772_v12 = vor.u32 %v913_v10, %v769_v11  ;;  %v759_v15 = vld [vmem:[#allocation2 + $0xc0] sm:$0xf]  ;;  %v664_v16 = vor.u32 %v888_v14, %v663_v13  ;;  %v912_v17 = vld [vmem:[#allocation2 + $0xc4] sm:$0xf0]  ;;  %v887_v18 = vld [vmem:[#allocation2 + $0x4] sm:$0xf] }
  0x1e   :  { %348 = vmatpush.bf16.msra.mxu3 %v768_v8  ;;  %v665_v19 = vld [vmem:[#allocation2 + $0x8] sm:$0xf0]  ;;  %v760_v20 = vor.u32 %v912_v17, %v759_v15  ;;  %v911_v22 = vld [vmem:[#allocation2 + $0xc4] sm:$0xf]  ;;  %v751_v25 = vld [vmem:[#allocation2 + $0xb0] sm:$0xf] }
  0x1f   :  { %125 = vmatpush.bf16.msrb.mxu1 %v658_v45  ;;  %v668_v21 = vor.u32 %v887_v18, %v665_v19  ;;  %v761_v23 = vld [vmem:[#allocation2 + $0xc8] sm:$0xf0]  ;;  %v910_v26 = vld [vmem:[#allocation2 + $0xb4] sm:$0xf0]  ;;  %v909_v27 = vld [vmem:[#allocation2 + $0xb4] sm:$0xf] }
  0x20   :  { %v764_v24 = vor.u32 %v911_v22, %v761_v23  ;;  %v752_v28 = vor.u32 %v910_v26, %v751_v25  ;;  %v753_v29 = vld [vmem:[#allocation2 + $0xb8] sm:$0xf0]  ;;  %v743_v31 = vld [vmem:[#allocation2 + $0xa0] sm:$0xf]  ;;  %v908_v32 = vld [vmem:[#allocation2 + $0xa4] sm:$0xf0] }
  0x21   :  { %337 = vmatpush.bf16.msra.mxu2 %v688_v56  ;;  %363 = vmatpush.bf16.msra.mxu0 %v692_v58  ;;  %v756_v30 = vor.u32 %v909_v27, %v753_v29  ;;  %v907_v33 = vld [vmem:[#allocation2 + $0xa4] sm:$0xf]  ;;  %v744_v34 = vor.u32 %v908_v32, %v743_v31  ;;  %v745_v35 = vld [vmem:[#allocation2 + $0xa8] sm:$0xf0]  ;;  %v906_v38 = vld [vmem:[#allocation2 + $0x94] sm:$0xf0] }
  0x22   :  { %349 = vmatpush.bf16.msra.mxu3 %v760_v20  ;;  %v748_v36 = vor.u32 %v907_v33, %v745_v35  ;;  %v905_v39 = vld [vmem:[#allocation2 + $0x94] sm:$0xf]  ;;  %v737_v41 = vld [vmem:[#allocation2 + $0x98] sm:$0xf0]  ;;  %v727_v43 = vld [vmem:[#allocation2 + $0x80] sm:$0xf] }
  0x23   :  { %372 = vmatpush.bf16.msra.mxu1 %v788_v49  ;;  %v740_v42 = vor.u32 %v905_v39, %v737_v41  ;;  %v904_v44 = vld [vmem:[#allocation2 + $0x84] sm:$0xf0]  ;;  %v903_v45 = vld [vmem:[#allocation2 + $0x84] sm:$0xf]  ;;  %v729_v47 = vld [vmem:[#allocation2 + $0x88] sm:$0xf0] }
  0x24   :  { %v728_v46 = vor.u32 %v904_v44, %v727_v43  ;;  %v732_v48 = vor.u32 %v903_v45, %v729_v47  ;;  %v934_v49 = vld [vmem:[#allocation5 + $0x78] sm:$0xff]  ;;  %v71_v51 = vld [vmem:[%s1156_s2] sm:$0x3]  ;;  %v933_v52 = vld [vmem:[#allocation5 + $0x70] sm:$0xff]  ;;  %vm631_vm2 = vcmask 392192  }
  0x25   :  { %338 = vmatpush.bf16.msra.mxu2 %v680_v63  ;;  %364 = vmatpush.bf16.msra.mxu0 %v684_v0  ;;  %v926_v50 = vld [vmem:[#allocation5 + $0x38] sm:$0xff]  ;;  %v73_v53 = vperm.slane %v71_v51, 0  ;;  %v74_v59 = vperm.slane %v71_v51, 1  ;;  %v932_v1 = vld [vmem:[#allocation5 + $0x68] sm:$0xff]  ;;  %v925_v2 = vld [vmem:[#allocation5 + $0x30] sm:$0xff] }
  0x26   :  { %350 = vmatpush.bf16.msra.mxu3 %v752_v28  ;;  %v931_v3 = vld [vmem:[#allocation5 + $0x60] sm:$0xff]  ;;  %v930_v5 = vld [vmem:[#allocation5 + $0x58] sm:$0xff]  ;;  %v929_v7 = vld [vmem:[#allocation5 + $0x50] sm:$0xff] }
  0x27   :  { %373 = vmatpush.bf16.msra.mxu1 %v780_v57  ;;  %v923_v6 = vld [vmem:[#allocation5 + $0x20] sm:$0xff]  ;;  %v922_v8 = vld [vmem:[#allocation5 + $0x18] sm:$0xff]  ;;  %v921_v10 = vld [vmem:[#allocation5 + $0x10] sm:$0xff] }
  0x28   :  { %v927_v11 = vld [vmem:[#allocation5 + $0x40] sm:$0xff]  ;;  %v942_v14 = vld [vmem:[%s1161_s7 + $0x38] sm:$0xff]  ;;  %v940_v17 = vld [vmem:[%s1161_s7 + $0x28] sm:$0xff] }
  0x29   :  { %339 = vmatpush.bf16.msra.mxu2 %v672_v4  ;;  %365 = vmatpush.bf16.msra.mxu0 %v676_v9  ;;  %v924_v4 = vld [vmem:[#allocation5 + $0x28] sm:$0xff]  ;;  %v919_v13 = vld [vmem:[#allocation5] sm:$0xff] }
  0x2a   :  { %660 = vmatmul.msk.bf16.vlgmr.msrb.gmra.mxu1 %vm92_vm1, %v67_v37  ;;  %351 = vmatpush.bf16.msra.mxu3 %v744_v34  ;;  %v735_v37 = vld [vmem:[#allocation2 + $0x90] sm:$0xf]  ;;  %v928_v9 = vld [vmem:[#allocation5 + $0x48] sm:$0xff]  ;;  %v167_v19 = vld [vmem:[%s1158_s4] sm:$0x3] }
  0x2b   :  { %374 = vmatpush.bf16.msra.mxu1 %v772_v12  ;;  %v736_v40 = vor.u32 %v906_v38, %v735_v37  ;;  %v920_v12 = vld [vmem:[#allocation5 + $0x8] sm:$0xff]  ;;  %v170_v22 = vperm.slane %v167_v19, 1  ;;  %v169_v26 = vperm.slane %v167_v19, 0  ;;  %v938_v37 = vld [vmem:[%s1161_s7 + $0x18] sm:$0xff]  ;;  %v937_v38 = vld [vmem:[%s1161_s7 + $0x10] sm:$0xff] }
  0x2c   :  { %v936_v39 = vld [vmem:[%s1161_s7 + $0x8] sm:$0xff] }
  0x2d   :  { %340 = vmatpush.bf16.msra.mxu2 %v664_v16  ;;  %366 = vmatpush.bf16.msra.mxu0 %v668_v21  ;;  %v941_v16 = vld [vmem:[%s1161_s7 + $0x30] sm:$0xff]  ;;  %v939_v21 = vld [vmem:[%s1161_s7 + $0x20] sm:$0xff] }
  0x2e   :  { %352 = vmatpush.bf16.msra.mxu3 %v736_v40  ;;  %v935_v40 = vld [vmem:[%s1161_s7] sm:$0xff]  ;;  %s1038_s7 = smov [#allocation7]  }
  0x2f   :  { %375 = vmatpush.bf16.msra.mxu1 %v764_v24  ;;  %s638_s30 = sshll.u32 %s1038_s7, 4  ;;  %s639_s30 = int_to_ptr.vmem [resolvable:$true] %s638_s30 }
  0x31   :  { %521 = vmatpush.bf16.msrb.mxu2 %v926_v50  ;;  %617 = vmatpush.bf16.msrb.mxu0 %v942_v14  ;;  %v952_v50 = vld [vmem:[%s1162_s8] ss:$0 sm:$0xff] }
  0x32   :  { %353 = vmatpush.bf16.msra.mxu3 %v728_v46 }
  0x33   :  { %376 = vmatpush.bf16.msra.mxu1 %v756_v30 }
  0x35   :  { %522 = vmatpush.bf16.msrb.mxu2 %v925_v2  ;;  %618 = vmatpush.bf16.msrb.mxu0 %v941_v16 }
  0x36   :  { %534 = vmatpush.bf16.msrb.mxu3 %v934_v49 }
  0x37   :  { %377 = vmatpush.bf16.msra.mxu1 %v748_v36 }
  0x39   :  { %523 = vmatpush.bf16.msrb.mxu2 %v924_v4  ;;  %619 = vmatpush.bf16.msrb.mxu0 %v940_v17 }
  0x3a   :  { %535 = vmatpush.bf16.msrb.mxu3 %v933_v52 }
  0x3b   :  { %378 = vmatpush.bf16.msra.mxu1 %v740_v42  ;;  %v951_v42 = vld [vmem:[%s1160_s6] ss:$0 sm:$0xff] }
  0x3d   :  { %524 = vmatpush.bf16.msrb.mxu2 %v923_v6  ;;  %620 = vmatpush.bf16.msrb.mxu0 %v939_v21 }
  0x3e   :  { %536 = vmatpush.bf16.msrb.mxu3 %v932_v1 }
  0x3f   :  { %379 = vmatpush.bf16.msra.mxu1 %v732_v48 }
  0x41   :  { %525 = vmatpush.bf16.msrb.mxu2 %v922_v8  ;;  %621 = vmatpush.bf16.msrb.mxu0 %v938_v37 }
  0x42   :  { %537 = vmatpush.bf16.msrb.mxu3 %v931_v3 }
  0x45   :  { %526 = vmatpush.bf16.msrb.mxu2 %v921_v10  ;;  %622 = vmatpush.bf16.msrb.mxu0 %v937_v38 }
  0x46   :  { %538 = vmatpush.bf16.msrb.mxu3 %v930_v5 }
  0x49   :  { %527 = vmatpush.bf16.msrb.mxu2 %v920_v12  ;;  %623 = vmatpush.bf16.msrb.mxu0 %v936_v39 }
  0x4a   :  { %539 = vmatpush.bf16.msrb.mxu3 %v929_v7 }
  0x4d   :  { %528 = vmatpush.bf16.msrb.mxu2 %v919_v13  ;;  %624 = vmatpush.bf16.msrb.mxu0 %v935_v40 }
  0x4e   :  { %540 = vmatpush.bf16.msrb.mxu3 %v928_v9 }
  0x52   :  { %541 = vmatpush.bf16.msrb.mxu3 %v927_v11 }
  0x97   :  { %v114_v54 = vpop.f32.mrf.mxu1 }
  0x98   :  { %v115_v55 = vadd.f32 %v114_v54, %v73_v53 }
  0x9a   :  { %v131_v56 = vmax.f32 %v115_v55, 0.0 }
  0x9c   :  { %v133_v57 = vpack.c.bf16 %v131_v56, %v131_v56 }
  0x9e   :  { %341 = vmatmul.bf16.vlgmr.msra.gmra.mxu2 %v133_v57  ;;  %367 = vmatmul.bf16.vlgmr.msra.gmra.mxu0 %v133_v57 }
  0x9f   :  { %v116_v58 = vpop.f32.mrf.mxu1 }
  0xa7   :  { %v127_v60 = vpop.f32.mrf.mxu1 }
  0xa8   :  { %v128_v61 = vadd.f32 %v127_v60, %v74_v59 }
  0xaa   :  { %v132_v62 = vmax.f32 %v128_v61, 0.0 }
  0xac   :  { %v134_v63 = vpack.c.bf16 %v132_v62, %v132_v62 }
  0xae   :  { %354 = vmatmul.bf16.vlgmr.msra.gmra.mxu3 %v134_v63  ;;  %380 = vmatmul.bf16.vlgmr.msra.gmra.mxu1 %v134_v63 }
  0xaf   :  { %v129_v0 = vpop.f32.mrf.mxu1 }
 0x11b   :  { %v368_v15 = vpop.f32.mrf.mxu0 }
 0x11c   :  { %v369_v24 = vadd.f32 %v368_v15, %v170_v22 }
 0x121   :  { %v342_v18 = vpop.f32.mrf.mxu2 }
 0x122   :  { %v343_v29 = vadd.f32 %v342_v18, %v169_v26 }
 0x123   :  { %v370_v20 = vpop.f32.mrf.mxu0 }
 0x129   :  { %v344_v23 = vpop.f32.mrf.mxu2 }
 0x12b   :  { %v381_v25 = vpop.f32.mrf.mxu1 }
 0x12c   :  { %v382_v27 = vadd.f32 %v381_v25, %v369_v24 }
 0x12e   :  { %v386_v28 = vmax.f32 %v382_v27, 0.0 }
 0x130   :  { %v388_v30 = vpack.c.bf16 %v386_v28, %v386_v28 }
 0x131   :  { %v355_v31 = vpop.f32.mrf.mxu3 }
 0x132   :  { %v356_v32 = vadd.f32 %v355_v31, %v343_v29  ;;  %542 = vmatmul.bf16.vlgmr.msrb.gmra.mxu3 %v388_v30 }
 0x133   :  { %v383_v33 = vpop.f32.mrf.mxu1 }
 0x134   :  { %v385_v34 = vmax.f32 %v356_v32, 0.0 }
 0x136   :  { %v387_v35 = vpack.c.bf16 %v385_v34, %v385_v34 }
 0x138   :  { %529 = vmatmul.bf16.vlgmr.msrb.gmra.mxu2 %v387_v35 }
 0x139   :  { %v357_v36 = vpop.f32.mrf.mxu3 }
 0x1b5   :  { %v543_v41 = vpop.f32.mrf.mxu3 }
 0x1bb   :  { %v530_v43 = vpop.f32.mrf.mxu2 }
 0x1bc   :  { %v531_v44 = vadd.f32 %v951_v42, %v530_v43 }
 0x1bd   :  { %v545_v45 = vpop.f32.mrf.mxu3 }
 0x1be   :  { %v544_v46 = vadd.f32 %v543_v41, %v531_v44 }
 0x1c0   :  { %v547_v47 = vmax.f32 %v544_v46, 0.0 }
 0x1c2   :  { %v548_v48 = vpack.c.bf16 %v547_v47, %v547_v47 }
 0x1c3   :  { %v532_v49 = vpop.f32.mrf.mxu2 }
 0x1c4   :  { %625 = vmatmul.bf16.vlgmr.msrb.gmra.mxu0 %v548_v48 }
 0x241   :  { %v626_v51 = vpop.f32.mrf.mxu0 }
 0x242   :  { %v627_v52 = vadd.f32 %v952_v50, %v626_v51 }
 0x244   :  { %v630_v53 = vmax.f32 %v627_v52, 0.0 }
 0x246   :  { %632 = vst.msk [vmem:[#allocation7] sm:$0xff] %vm631_vm2, %v630_v53 }
 0x247   :  { %643 = dma.vmem_to_hbm [thread:$0]  %s639_s30, 128, %s641_s0, [#allocation4]  }
 0x249   :  { %v628_v54 = vpop.f32.mrf.mxu0 }
 0x24a   :  { %1029 = dma.done.wait [#allocation4], 128  }
 0x24b   :  { %1030 = vsyncadd [#allocation4], 4294967168 }
 0x24c   :  { %648 = vsyncpa [#allocation3], 1 }
 0x24d   :  { %649 = vsyncpa [#allocation6], 1 }
 0x24e   :  { %650 = vsyncpa [#allocation4], 1 }

</bundles_post_ra>
